<compile_context>
chip_gen: v7x
topology: tpu7x:2x2x1
jax: 0.10.0
libtpu: 0.0.40
codegen_flags: <defaults>
</compile_context>

<pallas_src>
import jax
import jax.numpy as jnp
from jax.experimental import pallas as pl
from jax.experimental.pallas import tpu as pltpu

LANE = 128
SUBLANE = 8


def _round_up(n, m):
    return ((n + m - 1) // m) * m


def actor_kernel(x_ref, w1_ref, b1_ref, w2_ref, b2_ref, w3_ref, b3_ref, o_ref):
    # Fused MLP + softmax head for one batch tile.
    x = x_ref[...]                                                        # (TB, D)
    h1 = jnp.dot(x, w1_ref[...], preferred_element_type=jnp.float32) + b1_ref[...]
    h1 = jnp.maximum(h1, 0.0)                                             # (TB, 128)
    h2 = jnp.dot(h1, w2_ref[...], preferred_element_type=jnp.float32) + b2_ref[...]
    h2 = jnp.maximum(h2, 0.0)                                             # (TB, 64)
    logits = jnp.dot(h2, w3_ref[...], preferred_element_type=jnp.float32) + b3_ref[...]
    # Numerically stable softmax over the (lane-padded) action dimension.
    # Padded columns carry a -1e30 bias -> exp() underflows to exactly 0.
    m = jnp.max(logits, axis=-1, keepdims=True)
    e = jnp.exp(logits - m)
    s = jnp.sum(e, axis=-1, keepdims=True)
    o_ref[...] = (e / s).astype(o_ref.dtype)                              # (TB, 128)


def actor_forward(x, params, action_dim, *, block_b=256):
    """Returns softmax probabilities of shape (B, action_dim)."""
    # TODO(synk): torch.distributions.Categorical (sampling / log_prob) is a
    # host-side object; the kernel returns the probabilities that parametrize it.
    w1, b1, w2, b2, w3, b3 = params
    B, D = x.shape

    # Lane-dense action head: pad to a multiple of 128 lanes.
    out_pad = _round_up(action_dim, LANE)
    w3p = jnp.zeros((w3.shape[0], out_pad), w3.dtype).at[:, :action_dim].set(w3)
    b3p = jnp.full((1, out_pad), -1e30, b3.dtype).at[:, :action_dim].set(b3)

    # Batch tiling: pad B to a multiple of the tile; weights stay resident.
    tb = min(block_b, _round_up(B, SUBLANE))
    Bp = _round_up(B, tb)
    xp = jnp.pad(x, ((0, Bp - B), (0, 0))) if Bp != B else x
    grid = (Bp // tb,)

    def resident(shape):  # constant block index -> stays in VMEM across the grid
        return pl.BlockSpec(shape, lambda i: (0,) * len(shape))

    out = pl.pallas_call(
        actor_kernel,
        out_shape=jax.ShapeDtypeStruct((Bp, out_pad), jnp.float32),
        grid=grid,
        in_specs=[
            pl.BlockSpec((tb, D), lambda i: (i, 0)),
            resident(w1.shape), resident(b1.shape),
            resident(w2.shape), resident(b2.shape),
            resident(w3p.shape), resident(b3p.shape),
        ],
        out_specs=pl.BlockSpec((tb, out_pad), lambda i: (i, 0)),
        compiler_params=pltpu.CompilerParams(
            dimension_semantics=("parallel",)),
    )(xp, w1, b1, w2, b2, w3p, b3p)

    return out[:B, :action_dim]


def init_actor_params(key, state_dim, action_dim):
    """Deterministic init mimicking PyTorch nn.Linear default (uniform +-1/sqrt(fan_in)).
    Weights stored as (in_features, out_features)."""
    dims = [(state_dim, 128), (128, 64), (64, action_dim)]
    params = []
    for fan_in, fan_out in dims:
        key, kw, kb = jax.random.split(key, 3)
        bound = 1.0 / jnp.sqrt(float(fan_in))
        w = jax.random.uniform(kw, (fan_in, fan_out), jnp.float32, -bound, bound)
        b = jax.random.uniform(kb, (1, fan_out), jnp.float32, -bound, bound)
        params.extend([w, b])
    return tuple(params)


def actor_reference(x, params):
    w1, b1, w2, b2, w3, b3 = params
    h1 = jnp.maximum(x @ w1 + b1, 0.0)
    h2 = jnp.maximum(h1 @ w2 + b2, 0.0)
    return jax.nn.softmax(h2 @ w3 + b3, axis=-1)


if __name__ == "__main__":
    key = jax.random.PRNGKey(0)
    k_x, k_p = jax.random.split(key)

    batch, state_dim, action_dim = 8, 16, 4
    x = jax.random.normal(k_x, (batch, state_dim), dtype=jnp.float32)
    params = init_actor_params(k_p, state_dim, action_dim)

    probs = actor_forward(x, params, action_dim)
    probs = jax.block_until_ready(probs)

    ref = actor_reference(x, params)
    assert probs.shape == (batch, action_dim)
    assert jnp.allclose(probs, ref, atol=1e-5, rtol=1e-5)
    assert jnp.allclose(jnp.sum(probs, axis=-1), 1.0, atol=1e-5)

    print("KERNEL_OK")
</pallas_src>

<mosaic_0001>
module attributes {stable_mosaic.version = 11 : i64} {
  func.func @actor_kernel(%arg0: i32, %arg1: memref<8x16xf32, #tpu.memory_space<vmem>>, %arg2: memref<16x128xf32, #tpu.memory_space<vmem>>, %arg3: memref<1x128xf32, #tpu.memory_space<vmem>>, %arg4: memref<128x64xf32, #tpu.memory_space<vmem>>, %arg5: memref<1x64xf32, #tpu.memory_space<vmem>>, %arg6: memref<64x128xf32, #tpu.memory_space<vmem>>, %arg7: memref<1x128xf32, #tpu.memory_space<vmem>>, %arg8: memref<8x128xf32, #tpu.memory_space<vmem>>) attributes {dimension_semantics = [#tpu.dimension_semantics<parallel>], iteration_bounds = array<i64: 1>, scalar_prefetch = 0 : i64, scratch_operands = 0 : i64, tpu.core_type = #tpu.core_type<tc>, window_params = [{transform_indices = @transform_0, window_bounds = array<i64: 8, 16>}, {pipeline_mode = #tpu.pipeline_mode<synchronous>, transform_indices = @transform_1, window_bounds = array<i64: 16, 128>}, {pipeline_mode = #tpu.pipeline_mode<synchronous>, transform_indices = @transform_2, window_bounds = array<i64: 1, 128>}, {pipeline_mode = #tpu.pipeline_mode<synchronous>, transform_indices = @transform_3, window_bounds = array<i64: 128, 64>}, {pipeline_mode = #tpu.pipeline_mode<synchronous>, transform_indices = @transform_4, window_bounds = array<i64: 1, 64>}, {pipeline_mode = #tpu.pipeline_mode<synchronous>, transform_indices = @transform_5, window_bounds = array<i64: 64, 128>}, {pipeline_mode = #tpu.pipeline_mode<synchronous>, transform_indices = @transform_6, window_bounds = array<i64: 1, 128>}, {transform_indices = @transform_7, window_bounds = array<i64: 8, 128>}]} {
    %c0 = arith.constant 0 : index
    %c0_0 = arith.constant 0 : index
    %0 = vector.load %arg1[%c0, %c0_0] : memref<8x16xf32, #tpu.memory_space<vmem>>, vector<8x16xf32>
    %c0_1 = arith.constant 0 : index
    %c0_2 = arith.constant 0 : index
    %1 = vector.load %arg2[%c0_1, %c0_2] : memref<16x128xf32, #tpu.memory_space<vmem>>, vector<16x128xf32>
    %cst = arith.constant dense<0.000000e+00> : vector<8x128xf32>
    %2 = tpu.matmul %0, %1, %cst {dimension_numbers = #tpu.dot_dimension_numbers<[1], [0], [0], [1], [0, 0, 1, 1], [], []>} : vector<8x16xf32>, vector<16x128xf32>, vector<8x128xf32> -> vector<8x128xf32>
    %c0_3 = arith.constant 0 : index
    %c0_4 = arith.constant 0 : index
    %3 = vector.load %arg3[%c0_3, %c0_4] : memref<1x128xf32, #tpu.memory_space<vmem>>, vector<1x128xf32>
    %4 = vector.broadcast %3 : vector<1x128xf32> to vector<8x128xf32>
    %5 = arith.addf %2, %4 : vector<8x128xf32>
    %cst_5 = arith.constant 0.000000e+00 : f32
    %6 = vector.broadcast %cst_5 : f32 to vector<8x128xf32>
    %7 = arith.maximumf %5, %6 : vector<8x128xf32>
    %c0_6 = arith.constant 0 : index
    %c0_7 = arith.constant 0 : index
    %8 = vector.load %arg4[%c0_6, %c0_7] : memref<128x64xf32, #tpu.memory_space<vmem>>, vector<128x64xf32>
    %cst_8 = arith.constant dense<0.000000e+00> : vector<8x64xf32>
    %9 = tpu.matmul %7, %8, %cst_8 {dimension_numbers = #tpu.dot_dimension_numbers<[1], [0], [0], [1], [0, 0, 1, 1], [], []>} : vector<8x128xf32>, vector<128x64xf32>, vector<8x64xf32> -> vector<8x64xf32>
    %c0_9 = arith.constant 0 : index
    %c0_10 = arith.constant 0 : index
    %10 = vector.load %arg5[%c0_9, %c0_10] : memref<1x64xf32, #tpu.memory_space<vmem>>, vector<1x64xf32>
    %11 = vector.broadcast %10 : vector<1x64xf32> to vector<8x64xf32>
    %12 = arith.addf %9, %11 : vector<8x64xf32>
    %cst_11 = arith.constant 0.000000e+00 : f32
    %13 = vector.broadcast %cst_11 : f32 to vector<8x64xf32>
    %14 = arith.maximumf %12, %13 : vector<8x64xf32>
    %c0_12 = arith.constant 0 : index
    %c0_13 = arith.constant 0 : index
    %15 = vector.load %arg6[%c0_12, %c0_13] : memref<64x128xf32, #tpu.memory_space<vmem>>, vector<64x128xf32>
    %cst_14 = arith.constant dense<0.000000e+00> : vector<8x128xf32>
    %16 = tpu.matmul %14, %15, %cst_14 {dimension_numbers = #tpu.dot_dimension_numbers<[1], [0], [0], [1], [0, 0, 1, 1], [], []>} : vector<8x64xf32>, vector<64x128xf32>, vector<8x128xf32> -> vector<8x128xf32>
    %c0_15 = arith.constant 0 : index
    %c0_16 = arith.constant 0 : index
    %17 = vector.load %arg7[%c0_15, %c0_16] : memref<1x128xf32, #tpu.memory_space<vmem>>, vector<1x128xf32>
    %18 = vector.broadcast %17 : vector<1x128xf32> to vector<8x128xf32>
    %19 = arith.addf %16, %18 : vector<8x128xf32>
    %cst_17 = arith.constant dense<0xFF800000> : vector<8xf32>
    %20 = vector.multi_reduction <maximumf>, %19, %cst_17 [1] : vector<8x128xf32> to vector<8xf32>
    %21 = vector.shape_cast %20 : vector<8xf32> to vector<8x1xf32>
    %22 = vector.broadcast %21 : vector<8x1xf32> to vector<8x128xf32>
    %23 = arith.subf %19, %22 : vector<8x128xf32>
    %24 = math.exp %23 : vector<8x128xf32>
    %cst_18 = arith.constant dense<0.000000e+00> : vector<8xf32>
    %25 = vector.multi_reduction <add>, %24, %cst_18 [1] : vector<8x128xf32> to vector<8xf32>
    %26 = vector.shape_cast %25 : vector<8xf32> to vector<8x1xf32>
    %27 = vector.broadcast %26 : vector<8x1xf32> to vector<8x128xf32>
    %28 = arith.divf %24, %27 : vector<8x128xf32>
    %c0_19 = arith.constant 0 : index
    %c0_20 = arith.constant 0 : index
    %29 = vector.load %arg8[%c0_19, %c0_20] : memref<8x128xf32, #tpu.memory_space<vmem>>, vector<8x128xf32>
    tpu.vector_store %arg8[%c0_19, %c0_20], %28 {strides = array<i32>} : memref<8x128xf32, #tpu.memory_space<vmem>>, vector<8x128xf32>,
    return
  }
  func.func @transform_0(%arg0: i32) -> (i32, i32) {
    %c0_i32 = arith.constant 0 : i32
    %c0_i32_0 = arith.constant 0 : i32
    return %arg0, %c0_i32 : i32, i32
  }
  func.func @transform_1(%arg0: i32) -> (i32, i32) {
    %c0_i32 = arith.constant 0 : i32
    %c0_i32_0 = arith.constant 0 : i32
    %c0_i32_1 = arith.constant 0 : i32
    return %c0_i32, %c0_i32_0 : i32, i32
  }
  func.func @transform_2(%arg0: i32) -> (i32, i32) {
    %c0_i32 = arith.constant 0 : i32
    %c0_i32_0 = arith.constant 0 : i32
    %c0_i32_1 = arith.constant 0 : i32
    return %c0_i32, %c0_i32_0 : i32, i32
  }
  func.func @transform_3(%arg0: i32) -> (i32, i32) {
    %c0_i32 = arith.constant 0 : i32
    %c0_i32_0 = arith.constant 0 : i32
    %c0_i32_1 = arith.constant 0 : i32
    return %c0_i32, %c0_i32_0 : i32, i32
  }
  func.func @transform_4(%arg0: i32) -> (i32, i32) {
    %c0_i32 = arith.constant 0 : i32
    %c0_i32_0 = arith.constant 0 : i32
    %c0_i32_1 = arith.constant 0 : i32
    return %c0_i32, %c0_i32_0 : i32, i32
  }
  func.func @transform_5(%arg0: i32) -> (i32, i32) {
    %c0_i32 = arith.constant 0 : i32
    %c0_i32_0 = arith.constant 0 : i32
    %c0_i32_1 = arith.constant 0 : i32
    return %c0_i32, %c0_i32_0 : i32, i32
  }
  func.func @transform_6(%arg0: i32) -> (i32, i32) {
    %c0_i32 = arith.constant 0 : i32
    %c0_i32_0 = arith.constant 0 : i32
    %c0_i32_1 = arith.constant 0 : i32
    return %c0_i32, %c0_i32_0 : i32, i32
  }
  func.func @transform_7(%arg0: i32) -> (i32, i32) {
    %c0_i32 = arith.constant 0 : i32
    %c0_i32_0 = arith.constant 0 : i32
    return %arg0, %c0_i32 : i32, i32
  }
}

</mosaic_0001>

<bundles_post_ra>
// kernel: tpu_custom_call.1
= control target key start
LH: loop header
LB: loop body
LE: loop exit
PB: predicated region body
PF: predicated region fallthrough
CT: control target
= control target key end

     0   :  { %v485_v2 = vmov 0.0|0.0   ;;  %vm486_vm0 = vmmov 0   ;;  %v487_v4 = vmov 0.0   ;;  %vm37_vm1 = vcmask 130048   ;;  %s647_s0 = inlined_call_operand.vmem [shape: f32[8,16], index: 0, kind: input, shape index: {}]   ;;  %s648_s1 = inlined_call_operand.vmem [shape: f32[16,128], index: 1, kind: input, shape index: {}]   ;;  %s649_s2 = inlined_call_operand.vmem [shape: f32[1,128], index: 2, kind: input, shape index: {}]   ;;  %s650_s3 = inlined_call_operand.vmem [shape: f32[128,64], index: 3, kind: input, shape index: {}]   ;;  %s651_s4 = inlined_call_operand.vmem [shape: f32[1,64], index: 4, kind: input, shape index: {}]   ;;  %s652_s5 = inlined_call_operand.vmem [shape: f32[64,128], index: 5, kind: input, shape index: {}]   ;;  %s653_s6 = inlined_call_operand.vmem [shape: f32[1,128], index: 6, kind: input, shape index: {}]   ;;  %s654_s7 = inlined_call_operand.hbm [shape: f32[8,128], index: 7, kind: output, shape index: {}]  }
   0x1   :  { %v28_v0 = vld [vmem:[%s648_s1] sm:$0xff]  ;;  %v29_v1 = vld [vmem:[%s648_s1 + $0x8] sm:$0xff]  ;;  %414 = vmatprep.subr.bf16.mxu0 %v485_v2  ;;  %357 = vmatprep.mubr.msk.f32.mxu0 %vm486_vm0, %v487_v4  ;;  %v114_v7 = vld [vmem:[%s650_s3 + $0x10] sm:$0xff] }
   0x2   :  { %v415_v3 = vpack.c.bf16 %v29_v1, %v28_v0  ;;  %v112_v5 = vld [vmem:[%s650_s3] sm:$0xff]  ;;  %v113_v6 = vld [vmem:[%s650_s3 + $0x8] sm:$0xff]  ;;  %417 = vmatprep.subr.bf16.mxu1 %v485_v2  ;;  %v115_v9 = vld [vmem:[%s650_s3 + $0x18] sm:$0xff]  ;;  %392 = vmatprep.mubr.msk.f32.mxu1 %vm486_vm0, %v487_v4 }
   0x3   :  { %v418_v8 = vpack.c.bf16 %v113_v6, %v112_v5  ;;  %v27_v10 = vld [vmem:[%s647_s0] sm:$0xff]  ;;  %v421_v11 = vpack.c.bf16 %v115_v9, %v114_v7  ;;  %v117_v13 = vld [vmem:[%s650_s3 + $0x28] sm:$0xff] }
   0x4   :  { %416 = vmatpush3.bf16.msra.mxu0 %v415_v3  ;;  %v116_v12 = vld [vmem:[%s650_s3 + $0x20] sm:$0xff] }
   0x5   :  { %419 = vmatpush3.bf16.msra.mxu1 %v418_v8  ;;  %441 = vmatprep.subr.bf16.mxu0 %v485_v2 }
   0x6   :  { %420 = vmatprep.subr.bf16.mxu1 %v485_v2 }
   0x7   :  { %358 = vmatmul.mubr.msk.f32.vlgmr.msra.gmra.mrb[0].mxu0 %vm37_vm1, %v27_v10 }
   0x8   :  { %12 = vsyncpa [#allocation3], 0  ;;  %411 = vmatprep.mubr.msk.f32.mxu0 %vm486_vm0, %v487_v4  ;;  %v424_v14 = vpack.c.bf16 %v117_v13, %v116_v12  ;;  %v118_v15 = vld [vmem:[%s650_s3 + $0x30] sm:$0xff]  ;;  %v119_v16 = vld [vmem:[%s650_s3 + $0x38] sm:$0xff]  ;;  %vm221_vm2 = vcmask 523264  }
   0x9   :  { %422 = vmatpush3.bf16.msra.mxu1 %v421_v11  ;;  %v427_v17 = vpack.c.bf16 %v119_v16, %v118_v15  ;;  %v120_v18 = vld [vmem:[%s650_s3 + $0x40] sm:$0xff]  ;;  %v121_v19 = vld [vmem:[%s650_s3 + $0x48] sm:$0xff]  ;;  %v122_v21 = vld [vmem:[%s650_s3 + $0x50] sm:$0xff] }
   0xa   :  { %423 = vmatprep.subr.bf16.mxu1 %v485_v2  ;;  %v430_v20 = vpack.c.bf16 %v121_v19, %v120_v18  ;;  %v123_v22 = vld [vmem:[%s650_s3 + $0x58] sm:$0xff]  ;;  %v124_v24 = vld [vmem:[%s650_s3 + $0x60] sm:$0xff]  ;;  %v125_v25 = vld [vmem:[%s650_s3 + $0x68] sm:$0xff] }
   0xb   :  { %v433_v23 = vpack.c.bf16 %v123_v22, %v122_v21  ;;  %v436_v26 = vpack.c.bf16 %v125_v25, %v124_v24  ;;  %v126_v27 = vld [vmem:[%s650_s3 + $0x70] sm:$0xff]  ;;  %v127_v28 = vld [vmem:[%s650_s3 + $0x78] sm:$0xff]  ;;  %v206_v30 = vld [vmem:[%s652_s5] sm:$0xff] }
   0xc   :  { %v439_v29 = vpack.c.bf16 %v127_v28, %v126_v27  ;;  %v207_v31 = vld [vmem:[%s652_s5 + $0x8] sm:$0xff]  ;;  %v208_v32 = vld [vmem:[%s652_s5 + $0x10] sm:$0xff]  ;;  %v209_v34 = vld [vmem:[%s652_s5 + $0x18] sm:$0xff] }
   0xd   :  { %425 = vmatpush3.bf16.msra.mxu1 %v424_v14  ;;  %v442_v33 = vpack.c.bf16 %v207_v31, %v206_v30  ;;  %v445_v35 = vpack.c.bf16 %v209_v34, %v208_v32  ;;  %v210_v36 = vld [vmem:[%s652_s5 + $0x20] sm:$0xff]  ;;  %v211_v37 = vld [vmem:[%s652_s5 + $0x28] sm:$0xff]  ;;  %v212_v44 = vld [vmem:[%s652_s5 + $0x30] sm:$0xff] }
   0xe   :  { %426 = vmatprep.subr.bf16.mxu1 %v485_v2  ;;  %v448_v38 = vpack.c.bf16 %v211_v37, %v210_v36  ;;  %v319_v39 = vld [vmem:[%s649_s2] ss:$0 sm:$0xff]  ;;  %v213_v45 = vld [vmem:[%s652_s5 + $0x38] sm:$0xff] }
   0xf   :  { %443 = vmatpush3.bf16.msra.mxu0 %v442_v33  ;;  %v451_v46 = vpack.c.bf16 %v213_v45, %v212_v44  ;;  %v321_v47 = vld [vmem:[%s651_s4] ss:$0 sm:$0xff]  ;;  %s488_s4 = smov [#allocation2]  }
  0x10   :  { %444 = vmatprep.subr.bf16.mxu0 %v485_v2  ;;  %v322_v52 = vld [vmem:[%s653_s6] ss:$0 sm:$0xff]  ;;  %s311_s5 = sshll.u32 %s488_s4, 4  ;;  %s312_s5 = int_to_ptr.vmem [resolvable:$true] %s311_s5 }
  0x11   :  { %428 = vmatpush3.bf16.msra.mxu1 %v427_v17  ;;  %s461_s9 = scalar_lea.vmem %s312_s5, 128  ;;  %p466_p1 = scmp.lt.s32.totalorder %s312_s5, %s312_s5 }
  0x12   :  { %429 = vmatprep.subr.bf16.mxu1 %v485_v2  ;;  %p462_p0 = scmp.ne.s32.totalorder %s312_s5, %s461_s9  ;;  %p467_p2 = scmp.lt.s32.totalorder %s461_s9, %s461_s9 }
  0x13   :  { %446 = vmatpush3.bf16.msra.mxu0 %v445_v35 }
  0x14   :  { %447 = vmatprep.subr.bf16.mxu0 %v485_v2  ;;  %p468_p3 = por %p467_p2, %p466_p1 }
  0x15   :  { %431 = vmatpush3.bf16.msra.mxu1 %v430_v20 }
  0x16   :  { %432 = vmatprep.subr.bf16.mxu1 %v485_v2  ;;  %p469_p4 = pnand %p468_p3, %p462_p0 }
  0x17   :  { %449 = vmatpush3.bf16.msra.mxu0 %v448_v38 }
  0x18   :  { %450 = vmatprep.subr.bf16.mxu0 %v485_v2 }
  0x19   :  { %434 = vmatpush3.bf16.msra.mxu1 %v433_v23 }
  0x1a   :  { %435 = vmatprep.subr.bf16.mxu1 %v485_v2 }
  0x1b   :  { %452 = vmatpush3.bf16.msra.mxu0 %v451_v46 }
  0x1d   :  { %437 = vmatpush3.bf16.msra.mxu1 %v436_v26 }
  0x1e   :  { %438 = vmatprep.subr.bf16.mxu1 %v485_v2 }
  0x21   :  { %440 = vmatpush3.bf16.msra.mxu1 %v439_v29 }
  0xda   :  { %v107_v40 = vpop.f32.mrb[0].mxu0 }
  0xdb   :  { %v108_v41 = vadd.f32 %v319_v39, %v107_v40  ;;  %v359_v42 = vpop.f32.mrb[1].mxu0 }
  0xdd   :  { %v111_v43 = vmax.f32 %v108_v41, 0.0 }
  0xdf   :  { %393 = vmatmul.mubr.f32.vlgmr.msra.gmra.mrb[0].mxu1 %v111_v43 }
 0x1b2   :  { %v201_v48 = vpop.f32.mrb[0].mxu1 }
 0x1b3   :  { %v202_v49 = vadd.f32 %v321_v47, %v201_v48  ;;  %v394_v50 = vpop.f32.mrb[1].mxu1 }
 0x1b5   :  { %v205_v51 = vmax.f32 %v202_v49, 0.0 }
 0x1b7   :  { %412 = vmatmul.mubr.msk.f32.vlgmr.msra.gmra.mrb[2].mxu0 %vm221_vm2, %v205_v51 }
 0x28a   :  { %v291_v53 = vpop.f32.mrb[2].mxu0 }
 0x28b   :  { %v292_v54 = vadd.f32 %v322_v52, %v291_v53  ;;  %v413_v55 = vpop.f32.mrb[3].mxu0 }
 0x28d   :  { %295 = vmax.xlane.f32.xlu0 %v292_v54 }
 0x31a   :  { %v296_v56 = vpop.xlane.xlu0 %295 }
 0x31b   :  { %v297_v57 = vsub.f32 %v292_v54, %v296_v56 }
 0x31d   :  { %v298_v58 = vmul.f32 1.442695, %v297_v57 }
 0x31f   :  { %457 = vpow2.f32 %v298_v58 }
 0x329   :  { %v458_v59 = vpop.eup %457 }
 0x32a   :  { %300 = vadd.xlane.f32.xlu0 %v458_v59 }
 0x3b7   :  { %v301_v60 = vpop.xlane.xlu0 %300 }
 0x3b8   :  { %459 = vrcp.f32 %v301_v60 }
 0x3c2   :  { %v460_v61 = vpop.eup %459 }
 0x3c3   :  { %v303_v62 = vmul.f32 %v460_v61, %v458_v59 }
 0x3c5   :  { %304 = vst [vmem:[#allocation2] sm:$0xff] %v303_v62 }
 0x3c6   :  { %472 = shalt.err (!%p469_p4)
}
 0x3c7   :  { %s473_s1 = scalar_lea.hbm %s654_s7, 128 }
 0x3c8   :  { %p474_p5 = scmp.ne.s32.totalorder %s654_s7, %s473_s1  ;;  %p477_p6 = scmp.lt.u32.totalorder %s473_s1, %s654_s7 }
 0x3ca   :  { %p479_p7 = pnand %p477_p6, %p474_p5 }
 0x3cc   :  { %482 = shalt.err (!%p479_p7)
}
 0x3cd   :  { %314 = dma.vmem_to_hbm [thread:$0]  %s312_s5, 128, %s654_s7, [#allocation3]  }
 0x3ce   :  { %483 = dma.done.wait [#allocation3], 128  }
 0x3cf   :  { %484 = vsyncadd [#allocation3], 4294967168 }
 0x3d0   :  { %318 = vsyncpa [#allocation3], 1 }

</bundles_post_ra>
